<compile_context>
chip_gen: v7x
topology: tpu7x:2x2x1
jax: 0.10.0
libtpu: 0.0.40
codegen_flags: <defaults>
</compile_context>

<pallas_src>
import functools

import jax
import jax.numpy as jnp
from jax.experimental import pallas as pl
from jax.experimental.pallas import tpu as pltpu


def _cdiv(a, b):
    return -(-a // b)


def _round_up(a, b):
    return _cdiv(a, b) * b


# ----------------------------- kernels -------------------------------------


def _ln_row_kernel(x_ref, g_ref, b_ref, o_ref, *, eps, n_valid):
    """Full-row path: one block = TN whole samples (feature extent = full D)."""
    x = x_ref[...]
    if x.dtype != jnp.float32:
        x = x.astype(jnp.float32)
    # Fused single-pass statistics.
    s = jnp.sum(x, axis=-1, keepdims=True)                  # (TN, 1)
    ss = jnp.sum(x * x, axis=-1, keepdims=True)             # (TN, 1)
    n = float(n_valid)
    denom = float(max(n_valid - 1, 1))                      # torch.var default: unbiased
    mean = s / n
    var = (ss - s * mean) / denom
    inv_std = jax.lax.rsqrt(var + eps)                      # EUP, off the VPU path
    # gamma/beta: lane-dense (1, D) rows broadcast over the TN sublanes.
    y = (x - mean) * inv_std * g_ref[...] + b_ref[...]
    o_ref[...] = y.astype(o_ref.dtype)


def _ln_stats_kernel(x_ref, s_ref, ss_ref, *, d_total, td):
    """Chunked fallback, pass 1: accumulate sum / sum-of-squares over D chunks."""
    k = pl.program_id(1)

    @pl.when(k == 0)
    def _():
        s_ref[...] = jnp.zeros_like(s_ref)
        ss_ref[...] = jnp.zeros_like(ss_ref)

    x = x_ref[...]
    if x.dtype != jnp.float32:
        x = x.astype(jnp.float32)
    if d_total % td != 0:
        # Mask out-of-range feature columns in the last (partial) chunk.
        col = jax.lax.broadcasted_iota(jnp.int32, x.shape, 1) + k * td
        x = jnp.where(col < d_total, x, 0.0)
    s_ref[...] += jnp.sum(x, axis=-1, keepdims=True)
    ss_ref[...] += jnp.sum(x * x, axis=-1, keepdims=True)


def _ln_apply_kernel(x_ref, s_ref, ss_ref, g_ref, b_ref, o_ref, *, eps, n_valid):
    """Chunked fallback, pass 2: normalize one (TN, TD) chunk with row stats."""
    x = x_ref[...]
    if x.dtype != jnp.float32:
        x = x.astype(jnp.float32)
    s = s_ref[...]
    ss = ss_ref[...]
    n = float(n_valid)
    denom = float(max(n_valid - 1, 1))
    mean = s / n
    var = (ss - s * mean) / denom
    inv_std = jax.lax.rsqrt(var + eps)
    y = (x - mean) * inv_std * g_ref[...] + b_ref[...]
    o_ref[...] = y.astype(o_ref.dtype)


# ----------------------------- wrapper --------------------------------------


def _hw_vmem_budget():
    """Generation-aware usable-VMEM estimate (headroom for compiler scratch)."""
    try:
        cap = int(pltpu.get_tpu_info().vmem_capacity_bytes)
    except Exception:
        cap = 64 << 20  # safe default on every generation (v7x: 64 MiB per TC)
    # 128 MiB parts -> ~112 MiB usable; 64 MiB parts -> ~56 MiB usable.
    return max(cap - max(cap // 8, 8 << 20), 16 << 20)


def layer_norm(x, gamma, beta, eps=1e-5, *, vmem_budget_bytes=None):
    """x: (N, C, ...); gamma, beta: (C,). Matches the PyTorch module forward."""
    N = int(x.shape[0])
    C = int(x.shape[1])
    D = 1
    for d in x.shape[1:]:
        D *= int(d)
    rest = D // C
    assert gamma.shape == (C,) and beta.shape == (C,)

    in_b = jnp.dtype(x.dtype).itemsize
    out_b = in_b
    sub = {4: 8, 2: 16, 1: 32}.get(in_b, 8)  # min sublane tile per dtype

    hw_budget = _hw_vmem_budget()
    budget = hw_budget if vmem_budget_bytes is None else min(hw_budget, int(vmem_budget_bytes))

    # Free, layout-preserving reshape: each sample becomes one lane-dense row.
    x2 = x.reshape(N, D)

    # One-time, N-independent pre-broadcast of the per-channel affine to a
    # lane-dense (1, D) row matching the flattened (C * rest) layout.
    g = jnp.broadcast_to(gamma.astype(jnp.float32).reshape(C, 1), (C, rest)).reshape(1, D)
    b = jnp.broadcast_to(beta.astype(jnp.float32).reshape(C, 1), (C, rest)).reshape(1, D)

    gb_bytes = 2 * 2 * D * 4              # gamma + beta rows, double-buffered
    per_row = 2 * D * (in_b + out_b)      # x + out, double-buffered, per sample row
    small = 64 << 10                      # misc slack

    if sub * per_row + gb_bytes + small <= budget:
        # ------------- full-row path: one block spans the whole feature dim -------------
        if N <= sub:
            TN = N  # block dim == full array dim: exempt from sublane rule, no OOB rows
        else:
            tn_budget = max(sub, ((budget - gb_bytes - small) // per_row // sub) * sub)
            TN = min(tn_budget, _round_up(N, sub))
            # Prefer an even grid of >= 2 steps so both v7x TCs get equal block counts.
            while TN > sub and (_cdiv(N, TN) < 2 or _cdiv(N, TN) % 2 != 0):
                TN -= sub
        grid = _cdiv(N, TN)

        vmem_need = 2 * TN * D * (in_b + out_b) + gb_bytes + small
        vmem_limit = int(min(hw_budget, max(vmem_need + (2 << 20), 8 << 20)))

        kernel = functools.partial(_ln_row_kernel, eps=float(eps), n_valid=D)
        out = pl.pallas_call(
            kernel,
            out_shape=jax.ShapeDtypeStruct((N, D), x.dtype),
            grid_spec=pltpu.PrefetchScalarGridSpec(
                num_scalar_prefetch=0,
                grid=(grid,),
                in_specs=[
                    pl.BlockSpec((TN, D), lambda i: (i, 0)),
                    pl.BlockSpec((1, D), lambda i: (0, 0)),   # gamma (grid-invariant)
                    pl.BlockSpec((1, D), lambda i: (0, 0)),   # beta  (grid-invariant)
                ],
                out_specs=pl.BlockSpec((TN, D), lambda i: (i, 0)),
            ),
            compiler_params=pltpu.CompilerParams(
                dimension_semantics=("parallel",),
                vmem_limit_bytes=vmem_limit,
            ),
        )(x2, g, b)
        return out.reshape(x.shape)

    # ------------- feature-chunked two-pass fallback for very large D -------------
    TN = N if N <= sub else sub
    per_col = 2 * TN * (in_b + out_b) + 4 * 4   # x + out + gamma + beta per feature col
    TD = max(128, (((budget - small) // per_col) // 128) * 128)
    TD = min(TD, _round_up(D, 128))
    kc = _cdiv(D, TD)
    nb = _cdiv(N, TN)

    vmem_need = 2 * TN * TD * (in_b + out_b) + 4 * TD * 4 + 8 * TN * 4 + small
    vmem_limit = int(min(hw_budget, max(vmem_need + (2 << 20), 8 << 20)))

    # Pass 1: per-row sum / sum-of-squares, reducing over feature chunks.
    s, ss = pl.pallas_call(
        functools.partial(_ln_stats_kernel, d_total=D, td=TD),
        out_shape=(jax.ShapeDtypeStruct((N, 1), jnp.float32),
                   jax.ShapeDtypeStruct((N, 1), jnp.float32)),
        grid_spec=pltpu.PrefetchScalarGridSpec(
            num_scalar_prefetch=0,
            grid=(nb, kc),
            in_specs=[pl.BlockSpec((TN, TD), lambda i, k: (i, k))],
            out_specs=[pl.BlockSpec((TN, 1), lambda i, k: (i, 0)),
                       pl.BlockSpec((TN, 1), lambda i, k: (i, 0))],
        ),
        compiler_params=pltpu.CompilerParams(
            dimension_semantics=("parallel", "arbitrary"),
            vmem_limit_bytes=vmem_limit,
        ),
    )(x2)

    # Pass 2: normalize + affine per chunk (fully parallel grid).
    out = pl.pallas_call(
        functools.partial(_ln_apply_kernel, eps=float(eps), n_valid=D),
        out_shape=jax.ShapeDtypeStruct((N, D), x.dtype),
        grid_spec=pltpu.PrefetchScalarGridSpec(
            num_scalar_prefetch=0,
            grid=(nb, kc),
            in_specs=[
                pl.BlockSpec((TN, TD), lambda i, k: (i, k)),
                pl.BlockSpec((TN, 1), lambda i, k: (i, 0)),
                pl.BlockSpec((TN, 1), lambda i, k: (i, 0)),
                pl.BlockSpec((1, TD), lambda i, k: (0, k)),
                pl.BlockSpec((1, TD), lambda i, k: (0, k)),
            ],
            out_specs=pl.BlockSpec((TN, TD), lambda i, k: (i, k)),
        ),
        compiler_params=pltpu.CompilerParams(
            dimension_semantics=("parallel", "parallel"),
            vmem_limit_bytes=vmem_limit,
        ),
    )(x2, s, ss, g, b)
    return out.reshape(x.shape)


# ----------------------------- reference & test -----------------------------


def layer_norm_ref(x, gamma, beta, eps=1e-5):
    """Pure-JAX reference matching the PyTorch forward (unbiased variance)."""
    N = x.shape[0]
    flat = x.reshape(N, -1)
    stat_shape = (N,) + (1,) * (x.ndim - 1)
    mean = flat.mean(axis=1).reshape(stat_shape)
    var = flat.var(axis=1, ddof=1).reshape(stat_shape)
    y = (x - mean) / jnp.sqrt(var + eps)
    aff_shape = (1, -1) + (1,) * (x.ndim - 2)
    return y * gamma.reshape(aff_shape) + beta.reshape(aff_shape)


if __name__ == "__main__":
    key = jax.random.PRNGKey(0)
    kx, kg, kx2, kx3 = jax.random.split(key, 4)

    # Module-consistent small shape: batch=2, channels=4, spatial=16x16.
    N, C, H, W = 2, 4, 16, 16
    x = jax.random.normal(kx, (N, C, H, W), dtype=jnp.float32)
    # Deterministic params matching __init__: gamma ~ uniform(0,1), beta = 0.
    gamma = jax.random.uniform(kg, (C,), dtype=jnp.float32)
    beta = jnp.zeros((C,), dtype=jnp.float32)

    out = jax.block_until_ready(layer_norm(x, gamma, beta, eps=1e-5))
    ref = layer_norm_ref(x, gamma, beta, eps=1e-5)
    assert jnp.allclose(out, ref, atol=2e-5, rtol=1e-5), "mismatch (full-row path)"

    # Partial last row-block + even-grid selection (N % TN != 0, cdiv grid).
    x_b = jax.random.normal(kx2, (20, C, 8, 8), dtype=jnp.float32)
    out_b = jax.block_until_ready(layer_norm(x_b, gamma, beta, eps=1e-5))
    ref_b = layer_norm_ref(x_b, gamma, beta, eps=1e-5)
    assert jnp.allclose(out_b, ref_b, atol=2e-5, rtol=1e-5), "mismatch (partial row block)"

    # D not a multiple of 128 -> masked edge stores, no wrapper padding.
    x_c = jax.random.normal(kx3, (4, C, 5, 7), dtype=jnp.float32)
    out_c = jax.block_until_ready(layer_norm(x_c, gamma, beta, eps=1e-5))
    ref_c = layer_norm_ref(x_c, gamma, beta, eps=1e-5)
    assert jnp.allclose(out_c, ref_c, atol=2e-5, rtol=1e-5), "mismatch (non-128 D)"

    # Feature-chunked fallback (forced tiny budget -> partial feature chunk).
    out_d = jax.block_until_ready(
        layer_norm(x, gamma, beta, eps=1e-5, vmem_budget_bytes=96 << 10))
    assert jnp.allclose(out_d, ref, atol=2e-5, rtol=1e-5), "mismatch (chunked fallback)"

    print("KERNEL_OK")
</pallas_src>

<mosaic_0001>
module attributes {stable_mosaic.version = 11 : i64} {
  func.func @_ln_row_kernel(%arg0: i32, %arg1: memref<2x1024xf32, #tpu.memory_space<vmem>>, %arg2: memref<1x1024xf32, #tpu.memory_space<vmem>>, %arg3: memref<1x1024xf32, #tpu.memory_space<vmem>>, %arg4: memref<2x1024xf32, #tpu.memory_space<vmem>>) attributes {dimension_semantics = [#tpu.dimension_semantics<parallel>], iteration_bounds = array<i64: 1>, scalar_prefetch = 0 : i64, scratch_operands = 0 : i64, tpu.core_type = #tpu.core_type<tc>, window_params = [{transform_indices = @transform_0, window_bounds = array<i64: 2, 1024>}, {pipeline_mode = #tpu.pipeline_mode<synchronous>, transform_indices = @transform_1, window_bounds = array<i64: 1, 1024>}, {pipeline_mode = #tpu.pipeline_mode<synchronous>, transform_indices = @transform_2, window_bounds = array<i64: 1, 1024>}, {transform_indices = @transform_3, window_bounds = array<i64: 2, 1024>}]} {
    %c0 = arith.constant 0 : index
    %c0_0 = arith.constant 0 : index
    %0 = vector.load %arg1[%c0, %c0_0] : memref<2x1024xf32, #tpu.memory_space<vmem>>, vector<2x1024xf32>
    %cst = arith.constant dense<0.000000e+00> : vector<2xf32>
    %1 = vector.multi_reduction <add>, %0, %cst [1] : vector<2x1024xf32> to vector<2xf32>
    %2 = vector.shape_cast %1 : vector<2xf32> to vector<2x1xf32>
    %3 = arith.mulf %0, %0 : vector<2x1024xf32>
    %cst_1 = arith.constant dense<0.000000e+00> : vector<2xf32>
    %4 = vector.multi_reduction <add>, %3, %cst_1 [1] : vector<2x1024xf32> to vector<2xf32>
    %5 = vector.shape_cast %4 : vector<2xf32> to vector<2x1xf32>
    %cst_2 = arith.constant 1.024000e+03 : f32
    %6 = vector.broadcast %cst_2 : f32 to vector<2x1xf32>
    %7 = arith.divf %2, %6 : vector<2x1xf32>
    %8 = arith.mulf %2, %7 : vector<2x1xf32>
    %9 = arith.subf %5, %8 : vector<2x1xf32>
    %cst_3 = arith.constant 1.023000e+03 : f32
    %10 = vector.broadcast %cst_3 : f32 to vector<2x1xf32>
    %11 = arith.divf %9, %10 : vector<2x1xf32>
    %cst_4 = arith.constant 9.99999974E-6 : f32
    %12 = vector.broadcast %cst_4 : f32 to vector<2x1xf32>
    %13 = arith.addf %11, %12 : vector<2x1xf32>
    %14 = math.rsqrt %13 : vector<2x1xf32>
    %15 = vector.broadcast %7 : vector<2x1xf32> to vector<2x1024xf32>
    %16 = arith.subf %0, %15 : vector<2x1024xf32>
    %17 = vector.broadcast %14 : vector<2x1xf32> to vector<2x1024xf32>
    %18 = arith.mulf %16, %17 : vector<2x1024xf32>
    %c0_5 = arith.constant 0 : index
    %c0_6 = arith.constant 0 : index
    %19 = vector.load %arg2[%c0_5, %c0_6] : memref<1x1024xf32, #tpu.memory_space<vmem>>, vector<1x1024xf32>
    %20 = vector.broadcast %19 : vector<1x1024xf32> to vector<2x1024xf32>
    %21 = arith.mulf %18, %20 : vector<2x1024xf32>
    %c0_7 = arith.constant 0 : index
    %c0_8 = arith.constant 0 : index
    %22 = vector.load %arg3[%c0_7, %c0_8] : memref<1x1024xf32, #tpu.memory_space<vmem>>, vector<1x1024xf32>
    %23 = vector.broadcast %22 : vector<1x1024xf32> to vector<2x1024xf32>
    %24 = arith.addf %21, %23 : vector<2x1024xf32>
    %c0_9 = arith.constant 0 : index
    %c0_10 = arith.constant 0 : index
    %25 = vector.load %arg4[%c0_9, %c0_10] : memref<2x1024xf32, #tpu.memory_space<vmem>>, vector<2x1024xf32>
    tpu.vector_store %arg4[%c0_9, %c0_10], %24 {strides = array<i32>} : memref<2x1024xf32, #tpu.memory_space<vmem>>, vector<2x1024xf32>,
    return
  }
  func.func @transform_0(%arg0: i32) -> (i32, i32) {
    %c0_i32 = arith.constant 0 : i32
    %c0_i32_0 = arith.constant 0 : i32
    return %arg0, %c0_i32 : i32, i32
  }
  func.func @transform_1(%arg0: i32) -> (i32, i32) {
    %c0_i32 = arith.constant 0 : i32
    %c0_i32_0 = arith.constant 0 : i32
    %c0_i32_1 = arith.constant 0 : i32
    return %c0_i32, %c0_i32_0 : i32, i32
  }
  func.func @transform_2(%arg0: i32) -> (i32, i32) {
    %c0_i32 = arith.constant 0 : i32
    %c0_i32_0 = arith.constant 0 : i32
    %c0_i32_1 = arith.constant 0 : i32
    return %c0_i32, %c0_i32_0 : i32, i32
  }
  func.func @transform_3(%arg0: i32) -> (i32, i32) {
    %c0_i32 = arith.constant 0 : i32
    %c0_i32_0 = arith.constant 0 : i32
    return %arg0, %c0_i32 : i32, i32
  }
}

</mosaic_0001>

<bundles_post_ra>
// kernel: tpu_custom_call.1
= control target key start
LH: loop header
LB: loop body
LE: loop exit
PB: predicated region body
PF: predicated region fallthrough
CT: control target
= control target key end

     0   :  { %8 = vsyncpa [#allocation3], 0  ;;  %s609_s0 = inlined_call_operand.hbm [shape: f32[2,1024], index: 0, kind: input, shape index: {}]   ;;  %s610_s1 = inlined_call_operand.hbm [shape: f32[1,1024], index: 1, kind: input, shape index: {}]   ;;  %s611_s2 = inlined_call_operand.hbm [shape: f32[1,1024], index: 2, kind: input, shape index: {}]   ;;  %s612_s3 = inlined_call_operand.hbm [shape: f32[2,1024], index: 3, kind: output, shape index: {}]  }
   0x1   :  { %9 = vsyncpa [#allocation6], 0 }
   0x2   :  { %10 = vsyncpa [#allocation4], 0  ;;  %s473_s12 = smov [#allocation5]   ;;  %s474_s14 = smov [#allocation2]  }
   0x3   :  { %s27_s13 = sshll.u32 %s473_s12, 4  ;;  %s17_s15 = sshll.u32 %s474_s14, 4  ;;  %s28_s13 = int_to_ptr.vmem [resolvable:$true] %s27_s13  ;;  %s18_s15 = int_to_ptr.vmem [resolvable:$true] %s17_s15 }
   0x4   :  { %s379_s18 = scalar_lea.hbm %s610_s1, 128 }
   0x5   :  { %p380_p0 = scmp.ne.s32.totalorder %s610_s1, %s379_s18  ;;  %p383_p1 = scmp.lt.u32.totalorder %s379_s18, %s610_s1 }
   0x7   :  { %p385_p2 = pnand %p383_p1, %p380_p0 }
   0x9   :  { %388 = shalt.err (!%p385_p2)
}
   0xa   :  { %s389_s23 = scalar_lea.vmem %s28_s13, 128  ;;  %p394_p4 = scmp.lt.s32.totalorder %s28_s13, %s28_s13 }
   0xb   :  { %p390_p3 = scmp.ne.s32.totalorder %s28_s13, %s389_s23  ;;  %p395_p5 = scmp.lt.s32.totalorder %s389_s23, %s389_s23 }
   0xd   :  { %p396_p6 = por %p395_p5, %p394_p4 }
   0xf   :  { %p397_p7 = pnand %p396_p6, %p390_p3 }
  0x11   :  { %400 = shalt.err (!%p397_p7)
}
  0x12   :  { %30 = dma.hbm_to_vmem [thread:$0]  %s610_s1, 128, %s28_s13, [#allocation6]  }
  0x13   :  { %s401_s28 = scalar_lea.hbm %s609_s0, 256 }
  0x14   :  { %p402_p8 = scmp.ne.s32.totalorder %s609_s0, %s401_s28  ;;  %p405_p9 = scmp.lt.u32.totalorder %s401_s28, %s609_s0 }
  0x16   :  { %p407_p10 = pnand %p405_p9, %p402_p8 }
  0x18   :  { %410 = shalt.err (!%p407_p10)
}
  0x19   :  { %s411_s6 = scalar_lea.vmem %s18_s15, 256  ;;  %p416_p12 = scmp.lt.s32.totalorder %s18_s15, %s18_s15 }
  0x1a   :  { %p412_p11 = scmp.ne.s32.totalorder %s18_s15, %s411_s6  ;;  %p417_p13 = scmp.lt.s32.totalorder %s411_s6, %s411_s6 }
  0x1c   :  { %p418_p0 = por %p417_p13, %p416_p12 }
  0x1e   :  { %p419_p1 = pnand %p418_p0, %p412_p11 }
  0x20   :  { %422 = shalt.err (!%p419_p1)
}
  0x21   :  { %20 = dma.hbm_to_vmem [thread:$0]  %s609_s0, 256, %s18_s15, [#allocation3]  }
  0x22   :  { %s475_s8 = smov [#allocation7]   ;;  %s423_s12 = scalar_lea.hbm %s611_s2, 128 }
  0x23   :  { %s37_s9 = sshll.u32 %s475_s8, 4  ;;  %p424_p2 = scmp.ne.s32.totalorder %s611_s2, %s423_s12  ;;  %s38_s9 = int_to_ptr.vmem [resolvable:$true] %s37_s9 }
  0x24   :  { %p427_p3 = scmp.lt.u32.totalorder %s423_s12, %s611_s2 }
  0x26   :  { %p429_p4 = pnand %p427_p3, %p424_p2 }
  0x28   :  { %432 = shalt.err (!%p429_p4)
}
  0x29   :  { %s433_s18 = scalar_lea.vmem %s38_s9, 128  ;;  %p438_p6 = scmp.lt.s32.totalorder %s38_s9, %s38_s9 }
  0x2a   :  { %p434_p5 = scmp.ne.s32.totalorder %s38_s9, %s433_s18  ;;  %p439_p7 = scmp.lt.s32.totalorder %s433_s18, %s433_s18 }
  0x2c   :  { %p440_p8 = por %p439_p7, %p438_p6 }
  0x2e   :  { %p441_p9 = pnand %p440_p8, %p434_p5 }
  0x30   :  { %444 = shalt.err (!%p441_p9)
}
  0x31   :  { %40 = dma.hbm_to_vmem [thread:$0]  %s611_s2, 128, %s38_s9, [#allocation6]  }
  0x32   :  { %467 = dma.done.wait [#allocation3], 256  }
  0x33   :  { %468 = vsyncadd [#allocation3], 4294967040 }
  0x34   :  { %469 = dma.done.wait [#allocation6], 256  }
  0x35   :  { %470 = vsyncadd [#allocation6], 4294967040  ;;  %v58_v0 = vlaneseq  ;;  %v476_v1 = vmov 1983009808   ;;  %v540_v6 = vld [vmem:[#allocation2] sm:$0xff]  ;;  %v542_v7 = vld [vmem:[#allocation2 + $0x8] sm:$0xff] }
  0x36   :  { %v56_v2 = vunpack.c.l.s4 %v476_v1  ;;  %v54_v8 = vcombine.high %v540_v6, %v540_v6  ;;  %vm96_vm0 = vcmask 1041408   ;;  %v71_v10 = vcombine.high %v542_v7, %v542_v7  ;;  %s478_s2 = smov [#allocation8]  }
  0x37   :  { %v535_v3 = vshrl.u32 %v58_v0, 7  ;;  %v114_v11 = vmul.f32 %v540_v6, %v540_v6  ;;  %v115_v16 = vmul.f32 %v542_v7, %v542_v7  ;;  %v207_v0 = vld [vmem:[#allocation5] sm:$0xff]  ;;  %s359_s19 = sshll.u32 %s478_s2, 4  ;;  %s360_s19 = int_to_ptr.vmem [resolvable:$true] %s359_s19 }
  0x38   :  { %v57_v4 = vunpack.c.0.s8 %v56_v2  ;;  %s445_s20 = scalar_lea.vmem %s360_s19, 256  ;;  %p450_p11 = scmp.lt.s32.totalorder %s360_s19, %s360_s19 }
  0x39   :  { %v118_v17 = vcombine.high %v114_v11, %v114_v11  ;;  %v135_v28 = vcombine.high %v115_v16, %v115_v16  ;;  %v211_v60 = vsub.s32 0, %v535_v3  ;;  %v215_v61 = vsub.s32 1, %v535_v3  ;;  %p446_p10 = scmp.ne.s32.totalorder %s360_s19, %s445_s20  ;;  %p451_p12 = scmp.lt.s32.totalorder %s445_s20, %s445_s20 }
  0x3a   :  { %v538_v5 = vsub.s32 %v57_v4, %v535_v3  ;;  %v219_v62 = vsub.s32 2, %v535_v3  ;;  %v223_v63 = vsub.s32 3, %v535_v3  ;;  %v227_v1 = vsub.s32 4, %v535_v3 }
  0x3b   :  { %v231_v2 = vsub.s32 5, %v535_v3  ;;  %v235_v4 = vsub.s32 6, %v535_v3  ;;  %p452_p13 = por %p451_p12, %p450_p11 }
  0x3c   :  { %v61_v9 = vrot.slane %v540_v6, %v538_v5  ;;  %v68_v12 = vrot.slane %v54_v8, %v538_v5  ;;  %v78_v14 = vrot.slane %v542_v7, %v538_v5  ;;  %v125_v18 = vrot.slane %v114_v11, %v538_v5 }
  0x3d   :  { %v85_v22 = vrot.slane %v71_v10, %v538_v5  ;;  %v132_v24 = vrot.slane %v118_v17, %v538_v5  ;;  %v142_v31 = vrot.slane %v115_v16, %v538_v5  ;;  %v149_v40 = vrot.slane %v135_v28, %v538_v5  ;;  %v279_v17 = vld [vmem:[#allocation7] sm:$0xff]  ;;  %p453_p0 = pnand %p452_p13, %p446_p10 }
  0x3e   :  { %v69_v13 = vcombine.high %v61_v9, %v61_v9  ;;  %v97_v15 = vsel %vm96_vm0, %v61_v9, 0.0  ;;  %v70_v19 = vcombine.high %v68_v12, %v68_v12  ;;  %v100_v21 = vsel %vm96_vm0, %v68_v12, 0.0 }
  0x3f   :  { %v86_v25 = vcombine.high %v78_v14, %v78_v14  ;;  %v133_v27 = vcombine.high %v125_v18, %v125_v18  ;;  %v134_v30 = vcombine.high %v132_v24, %v132_v24  ;;  %v160_v32 = vsel %vm96_vm0, %v125_v18, 0.0 }
  0x40   :  { %v98_v20 = vsel %vm96_vm0, %v69_v13, 0.0  ;;  %v102_v26 = vsel %vm96_vm0, %v70_v19, 0.0  ;;  %v104_v33 = vsel %vm96_vm0, %v78_v14, 0.0  ;;  %v163_v35 = vsel %vm96_vm0, %v132_v24, 0.0 }
  0x41   :  { %v99_v23 = vadd.f32 %v98_v20, %v97_v15  ;;  %v161_v34 = vsel %vm96_vm0, %v133_v27, 0.0  ;;  %v87_v36 = vcombine.high %v85_v22, %v85_v22  ;;  %v106_v39 = vsel %vm96_vm0, %v86_v25, 0.0 }
  0x42   :  { %v162_v38 = vadd.f32 %v161_v34, %v160_v32  ;;  %v150_v41 = vcombine.high %v142_v31, %v142_v31  ;;  %v165_v42 = vsel %vm96_vm0, %v134_v30, 0.0  ;;  %v108_v45 = vsel %vm96_vm0, %v85_v22, 0.0 }
  0x43   :  { %v101_v29 = vadd.f32 %v100_v21, %v99_v23  ;;  %v167_v46 = vsel %vm96_vm0, %v142_v31, 0.0  ;;  %v110_v49 = vsel %vm96_vm0, %v87_v36, 0.0  ;;  %v151_v50 = vcombine.high %v149_v40, %v149_v40 }
  0x44   :  { %v164_v44 = vadd.f32 %v163_v35, %v162_v38  ;;  %v169_v51 = vsel %vm96_vm0, %v150_v41, 0.0  ;;  %v171_v54 = vsel %vm96_vm0, %v149_v40, 0.0  ;;  %v239_v8 = vsub.s32 7, %v535_v3 }
  0x45   :  { %v103_v37 = vadd.f32 %v102_v26, %v101_v29  ;;  %v173_v57 = vsel %vm96_vm0, %v151_v50, 0.0  ;;  %v212_v9 = vrot.slane %v207_v0, %v211_v60  ;;  %v216_v10 = vrot.slane %v207_v0, %v215_v61 }
  0x46   :  { %v166_v48 = vadd.f32 %v165_v42, %v164_v44  ;;  %v220_v11 = vrot.slane %v207_v0, %v219_v62  ;;  %v224_v12 = vrot.slane %v207_v0, %v223_v63  ;;  %v228_v13 = vrot.slane %v207_v0, %v227_v1 }
  0x47   :  { %v105_v43 = vadd.f32 %v104_v33, %v103_v37  ;;  %v232_v14 = vrot.slane %v207_v0, %v231_v2  ;;  %v236_v15 = vrot.slane %v207_v0, %v235_v4  ;;  %v240_v16 = vrot.slane %v207_v0, %v239_v8 }
  0x48   :  { %v168_v53 = vadd.f32 %v167_v46, %v166_v48  ;;  %v241_v18 = vcombine.low %v212_v9, %v216_v10  ;;  %v242_v19 = vcombine.low %v220_v11, %v224_v12  ;;  %v284_v20 = vrot.slane %v279_v17, %v211_v60 }
  0x49   :  { %v107_v47 = vadd.f32 %v106_v39, %v105_v43  ;;  %v288_v21 = vrot.slane %v279_v17, %v215_v61  ;;  %v258_v22 = vcombine.low %v228_v13, %v232_v14  ;;  %v259_v23 = vcombine.low %v236_v15, %v240_v16 }
  0x4a   :  { %v170_v56 = vadd.f32 %v169_v51, %v168_v53  ;;  %v292_v24 = vrot.slane %v279_v17, %v219_v62  ;;  %v296_v25 = vrot.slane %v279_v17, %v223_v63  ;;  %v249_v26 = vrot.slane %v241_v18, %v538_v5 }
  0x4b   :  { %v109_v52 = vadd.f32 %v108_v45, %v107_v47  ;;  %v256_v27 = vrot.slane %v242_v19, %v538_v5  ;;  %v300_v28 = vrot.slane %v279_v17, %v227_v1  ;;  %v304_v29 = vrot.slane %v279_v17, %v231_v2 }
  0x4c   :  { %v172_v58 = vadd.f32 %v171_v54, %v170_v56  ;;  %v266_v30 = vrot.slane %v258_v22, %v538_v5  ;;  %v273_v31 = vrot.slane %v259_v23, %v538_v5  ;;  %v308_v32 = vrot.slane %v279_v17, %v235_v4 }
  0x4d   :  { %v111_v55 = vadd.f32 %v110_v49, %v109_v52  ;;  %v312_v33 = vrot.slane %v279_v17, %v239_v8  ;;  %v257_v34 = vcombine.low %v249_v26, %v256_v27  ;;  %v313_v35 = vcombine.low %v284_v20, %v288_v21 }
  0x4e   :  { %v174_v59 = vadd.f32 %v173_v57, %v172_v58  ;;  %v314_v36 = vcombine.low %v292_v24, %v296_v25  ;;  %v330_v37 = vcombine.low %v300_v28, %v304_v29  ;;  %v274_v38 = vcombine.low %v266_v30, %v273_v31 }
  0x4f   :  { %112 = vadd.xlane.f32.xlu0 %v111_v55  ;;  %v331_v39 = vcombine.low %v308_v32, %v312_v33  ;;  %v321_v40 = vrot.slane %v313_v35, %v538_v5  ;;  %v477_v51 = vmov 269488144  }
  0x50   :  { %v328_v41 = vrot.slane %v314_v36, %v538_v5  ;;  %v338_v42 = vrot.slane %v330_v37, %v538_v5  ;;  %v187_v52 = vunpack.c.l.s4 %v477_v51 }
  0x51   :  { %v345_v43 = vrot.slane %v331_v39, %v538_v5 }
  0x52   :  { %v329_v44 = vcombine.low %v321_v40, %v328_v41  ;;  %v188_v55 = vunpack.c.0.s8 %v187_v52 }
  0x53   :  { %175 = vadd.xlane.f32.xlu0 %v174_v59  ;;  %v346_v45 = vcombine.low %v338_v42, %v345_v43 }
  0x54   :  { %v191_v56 = vsub.s32 %v188_v55, %v535_v3 }
  0xdc   :  { %v113_v46 = vpop.xlane.xlu0 %112 }
  0xdd   :  { %v178_v47 = vmul.f32 0.0009765625, %v113_v46 }
  0xdf   :  { %v179_v48 = vmul.f32 %v178_v47, %v113_v46  ;;  %v192_v57 = vrot.slane %v178_v47, %v191_v56 }
  0xe0   :  { %v176_v49 = vpop.xlane.xlu0 %175 }
  0xe1   :  { %v180_v50 = vsub.f32 %v176_v49, %v179_v48  ;;  %v194_v59 = vsub.f32 %v540_v6, %v192_v57  ;;  %v195_v5 = vsub.f32 %v542_v7, %v192_v57 }
  0xe3   :  { %v182_v53 = vmul.f32 0.0009775171, %v180_v50 }
  0xe5   :  { %v183_v54 = vadd.f32 1e-05, %v182_v53 }
  0xe7   :  { %377 = vrsqrt.f32 %v183_v54 }
  0xf1   :  { %v378_v58 = vpop.eup %377 }
  0xf2   :  { %v203_v60 = vrot.slane %v378_v58, %v191_v56 }
  0xf4   :  { %v205_v61 = vmul.f32 %v203_v60, %v194_v59  ;;  %v206_v62 = vmul.f32 %v203_v60, %v195_v5 }
  0xf6   :  { %v277_v63 = vmul.f32 %v257_v34, %v205_v61  ;;  %v278_v0 = vmul.f32 %v274_v38, %v206_v62 }
  0xf8   :  { %v349_v1 = vadd.f32 %v329_v44, %v277_v63  ;;  %v350_v2 = vadd.f32 %v346_v45, %v278_v0 }
  0xfa   :  { %351 = vst [vmem:[#allocation8] sm:$0xff] %v349_v1  ;;  %352 = vst [vmem:[#allocation8 + $0x8] sm:$0xff] %v350_v2 }
  0xfb   :  { %456 = shalt.err (!%p453_p0)
}
  0xfc   :  { %s457_s23 = scalar_lea.hbm %s612_s3, 256 }
  0xfd   :  { %p458_p1 = scmp.ne.s32.totalorder %s612_s3, %s457_s23  ;;  %p461_p2 = scmp.lt.u32.totalorder %s457_s23, %s612_s3 }
  0xff   :  { %p463_p3 = pnand %p461_p2, %p458_p1 }
 0x101   :  { %466 = shalt.err (!%p463_p3)
}
 0x102   :  { %362 = dma.vmem_to_hbm [thread:$0]  %s360_s19, 256, %s612_s3, [#allocation4]  }
 0x103   :  { %471 = dma.done.wait [#allocation4], 256  }
 0x104   :  { %472 = vsyncadd [#allocation4], 4294967040 }
 0x105   :  { %366 = vsyncpa [#allocation3], 1 }
 0x106   :  { %367 = vsyncpa [#allocation6], 1 }
 0x107   :  { %368 = vsyncpa [#allocation4], 1 }

</bundles_post_ra>
